<compile_context>
chip_gen: v7x
topology: tpu7x:2x2x1
jax: 0.10.0
libtpu: 0.0.40
codegen_flags: <defaults>
</compile_context>

<pallas_src>
import functools

import jax
import jax.numpy as jnp
from jax.experimental import pallas as pl
from jax.experimental.pallas import tpu as pltpu

LN_EPS = 1e-5  # torch.nn.LayerNorm default eps


def _round_up(x, m):
    return (x + m - 1) // m * m


def _layernorm_relu(h, real_dim):
    """LayerNorm(elementwise_affine=False) over the last dim, then ReLU.

    `h` may be lane-padded; its padded columns are exactly zero before LN
    (padded weight columns / bias entries are zero), so sums over the padded
    width equal sums over the real columns and dividing by `real_dim` gives
    the correct mean / E[h^2].  One-pass variance: E[h^2] - mean^2.
    """
    inv_n = 1.0 / float(real_dim)
    mean = jnp.sum(h, axis=-1, keepdims=True) * inv_n
    mean_sq = jnp.sum(h * h, axis=-1, keepdims=True) * inv_n
    var = mean_sq - mean * mean
    h = (h - mean) * jax.lax.rsqrt(var + LN_EPS)
    return jnp.maximum(h, 0.0)


def decoder_softmax_kernel(z_ref, w0_ref, b0_ref, ws_ref, bs_ref, wo_ref, bo_ref,
                           o_ref, h_ref, *, h_dim, x_dim, apply_seq):
    """Grid = (batch_tile, layer).  h_ref is a per-batch-tile VMEM accumulator."""
    l = pl.program_id(1)

    # --- z2h: Linear -> LayerNorm -> ReLU (first layer step only) ---
    @pl.when(l == 0)
    def _():
        h = jnp.dot(z_ref[...].astype(jnp.bfloat16), w0_ref[...],
                    preferred_element_type=jnp.float32) + b0_ref[...]
        h_ref[...] = _layernorm_relu(h, h_dim)

    # --- seq_nn layer l: Linear -> LayerNorm -> ReLU (weight streamed per step) ---
    if apply_seq:
        h = jnp.dot(h_ref[...].astype(jnp.bfloat16), ws_ref[0],
                    preferred_element_type=jnp.float32) + bs_ref[0]
        h_ref[...] = _layernorm_relu(h, h_dim)
        # Padded columns of h_ref may be nonzero after LN/ReLU, but the padded
        # rows of the next weight matrix are zero, so they contribute nothing.

    # --- h2ld + softmax over the feature axis (last layer step only) ---
    @pl.when(l == pl.num_programs(1) - 1)
    def _():
        ld = jnp.dot(h_ref[...].astype(jnp.bfloat16), wo_ref[...],
                     preferred_element_type=jnp.float32) + bo_ref[...]
        # Mask lane-padded logits so they do not pollute max / sum.
        col = jax.lax.broadcasted_iota(jnp.int32, ld.shape, 1)
        ld = jnp.where(col < x_dim, ld, -1e30)
        m = jnp.max(ld, axis=-1, keepdims=True)
        e = jnp.exp(ld - m)
        inv = pl.reciprocal(jnp.sum(e, axis=-1, keepdims=True), approx=False)
        o_ref[...] = (e * inv).astype(o_ref.dtype)


def decoder_softmax(z, params, *, tile_b=256):
    """Pallas wrapper. params = (w0, b0, ws, bs, wo, bo)."""
    w0, b0, ws, bs, wo, bo = params
    B, z_dim = z.shape
    h_dim = w0.shape[1]
    x_dim = wo.shape[1]
    L = int(ws.shape[0])
    L_grid = max(L, 1)

    f32, bf16 = jnp.float32, jnp.bfloat16

    # Lane-align feature dims to 128; sublane-align / tile the batch.
    zp = _round_up(z_dim, 128)
    hp = _round_up(h_dim, 128)
    xp = _round_up(x_dim, 128)
    tb = min(tile_b, _round_up(B, 8))
    Bp = _round_up(B, tb)

    # Zero-pad inputs / params. Weights -> bf16 (halves DMA + VMEM, MXU-native),
    # biases stay f32 (added after the f32-accumulated matmul).
    z_p = jnp.zeros((Bp, zp), f32).at[:B, :z_dim].set(z.astype(f32))
    w0_p = jnp.zeros((zp, hp), bf16).at[:z_dim, :h_dim].set(w0.astype(bf16))
    b0_p = jnp.zeros((1, hp), f32).at[:, :h_dim].set(b0.astype(f32).reshape(1, h_dim))
    if L > 0:
        ws_p = jnp.zeros((L, hp, hp), bf16).at[:, :h_dim, :h_dim].set(ws.astype(bf16))
        bs_p = jnp.zeros((L, 1, hp), f32).at[:, :, :h_dim].set(
            bs.astype(f32).reshape(L, 1, h_dim))
    else:  # dummy single (zero) layer so the BlockSpec/grid stay well-formed
        ws_p = jnp.zeros((1, hp, hp), bf16)
        bs_p = jnp.zeros((1, 1, hp), f32)
    wo_p = jnp.zeros((hp, xp), bf16).at[:h_dim, :x_dim].set(wo.astype(bf16))
    bo_p = jnp.zeros((1, xp), f32).at[:, :x_dim].set(bo.astype(f32).reshape(1, x_dim))

    kernel = functools.partial(decoder_softmax_kernel,
                               h_dim=h_dim, x_dim=x_dim, apply_seq=(L > 0))

    grid = (Bp // tb, L_grid)

    in_specs = [
        pl.BlockSpec((tb, zp), lambda i, l: (i, 0)),        # z: tiled over batch
        pl.BlockSpec((zp, hp), lambda i, l: (0, 0)),        # w0: resident
        pl.BlockSpec((1, hp), lambda i, l: (0, 0)),         # b0: resident
        pl.BlockSpec((1, hp, hp), lambda i, l: (l, 0, 0)),  # ws: streamed per layer
        pl.BlockSpec((1, 1, hp), lambda i, l: (l, 0, 0)),   # bs: streamed per layer
        pl.BlockSpec((hp, xp), lambda i, l: (0, 0)),        # wo: resident
        pl.BlockSpec((1, xp), lambda i, l: (0, 0)),         # bo: resident
    ]
    out_specs = pl.BlockSpec((tb, xp), lambda i, l: (i, 0))

    # Explicit VMEM budget: double-buffered z/out tiles + streamed layer block
    # (x2) + resident weights (x2 safety) + h scratch + headroom.
    vmem_bytes = (
        2 * (tb * zp * 4 + tb * xp * 4)
        + 2 * (hp * hp * 2 + hp * 4)
        + 2 * (zp * hp * 2 + hp * xp * 2 + hp * 4 + xp * 4)
        + tb * hp * 4
        + (8 << 20)
    )
    vmem_limit = int(min(64 << 20, max(vmem_bytes, 16 << 20)))

    flops = 2 * B * (z_dim * h_dim + L * h_dim * h_dim + h_dim * x_dim)
    transcend = B * (x_dim + (L + 1))  # softmax exps + one rsqrt per LN row
    bytes_accessed = (
        B * z_dim * 4 + B * x_dim * 4
        + w0_p.size * 2 + ws_p.size * 2 + wo_p.size * 2
        + b0_p.size * 4 + bs_p.size * 4 + bo_p.size * 4
    )

    out_p = pl.pallas_call(
        kernel,
        out_shape=jax.ShapeDtypeStruct((Bp, xp), jnp.float32),
        grid_spec=pltpu.PrefetchScalarGridSpec(
            num_scalar_prefetch=0,
            grid=grid,
            in_specs=in_specs,
            out_specs=out_specs,
            scratch_shapes=[pltpu.VMEM((tb, hp), jnp.float32)],
        ),
        compiler_params=pltpu.CompilerParams(
            dimension_semantics=("parallel", "arbitrary"),
            vmem_limit_bytes=vmem_limit,
        ),
        cost_estimate=pl.CostEstimate(
            flops=int(flops),
            transcendentals=int(transcend),
            bytes_accessed=int(bytes_accessed),
        ),
    )(z_p, w0_p, b0_p, ws_p, bs_p, wo_p, bo_p)

    return out_p[:B, :x_dim]


def init_params(key, num_h_layers, z_dim, h_dim, x_dim):
    """Deterministic synthetic parameters (shapes match the PyTorch module)."""
    ks = jax.random.split(key, 6)
    L = num_h_layers - 1
    scale_z = 1.0 / jnp.sqrt(jnp.float32(z_dim))
    scale_h = 1.0 / jnp.sqrt(jnp.float32(h_dim))
    w0 = jax.random.normal(ks[0], (z_dim, h_dim), jnp.float32) * scale_z
    b0 = jax.random.normal(ks[1], (1, h_dim), jnp.float32) * scale_z
    ws = jax.random.normal(ks[2], (L, h_dim, h_dim), jnp.float32) * scale_h
    bs = jax.random.normal(ks[3], (L, 1, h_dim), jnp.float32) * scale_h
    wo = jax.random.normal(ks[4], (h_dim, x_dim), jnp.float32) * scale_h
    bo = jax.random.normal(ks[5], (1, x_dim), jnp.float32) * scale_h
    return w0, b0, ws, bs, wo, bo


def decoder_softmax_ref(z, params):
    """Pure-JAX f32 reference (two-pass LayerNorm, plain softmax)."""
    w0, b0, ws, bs, wo, bo = params

    def ln_relu(h):
        mean = jnp.mean(h, axis=-1, keepdims=True)
        var = jnp.mean((h - mean) ** 2, axis=-1, keepdims=True)
        return jnp.maximum((h - mean) * jax.lax.rsqrt(var + LN_EPS), 0.0)

    h = ln_relu(z @ w0 + b0)
    for l in range(ws.shape[0]):
        h = ln_relu(h @ ws[l] + bs[l])
    ld = h @ wo + bo
    return jax.nn.softmax(ld, axis=1)


if __name__ == "__main__":
    # Small shapes consistent with the module's forward: z is [batch, z_dim].
    batch, z_dim, h_dim, x_dim = 8, 16, 32, 16
    num_h_layers = 3  # -> 2 LinearReLU layers inside SeqNN

    key = jax.random.PRNGKey(0)
    kz, kp = jax.random.split(key)
    z = jax.random.normal(kz, (batch, z_dim), jnp.float32)
    params = init_params(kp, num_h_layers, z_dim, h_dim, x_dim)

    out = decoder_softmax(z, params)
    out = jax.block_until_ready(out)

    ref = decoder_softmax_ref(z, params)
    assert out.shape == (batch, x_dim)
    # bf16 matmul inputs (f32 accumulation) -> loosened tolerance vs f32 reference.
    assert jnp.allclose(out, ref, atol=3e-2, rtol=3e-2), "mismatch vs reference"
    # softmax rows sum to 1 (computed in f32)
    assert jnp.allclose(jnp.sum(out, axis=1), 1.0, atol=1e-5)

    print("KERNEL_OK")
</pallas_src>

<mosaic_0001>
module attributes {stable_mosaic.version = 11 : i64} {
  func.func @decoder_softmax_kernel(%arg0: i32, %arg1: i32, %arg2: memref<8x128xf32, #tpu.memory_space<vmem>>, %arg3: memref<128x128xbf16, #tpu.memory_space<vmem>>, %arg4: memref<1x128xf32, #tpu.memory_space<vmem>>, %arg5: memref<1x128x128xbf16, #tpu.memory_space<vmem>>, %arg6: memref<1x1x128xf32, #tpu.memory_space<vmem>>, %arg7: memref<128x128xbf16, #tpu.memory_space<vmem>>, %arg8: memref<1x128xf32, #tpu.memory_space<vmem>>, %arg9: memref<8x128xf32, #tpu.memory_space<vmem>>, %arg10: memref<8x128xf32, #tpu.memory_space<vmem>>) attributes {dimension_semantics = [#tpu.dimension_semantics<parallel>, #tpu.dimension_semantics<arbitrary>], iteration_bounds = array<i64: 1, 2>, scalar_prefetch = 0 : i64, scratch_operands = 1 : i64, tpu.core_type = #tpu.core_type<tc>, window_params = [{transform_indices = @transform_0, window_bounds = array<i64: 8, 128>}, {pipeline_mode = #tpu.pipeline_mode<synchronous>, transform_indices = @transform_1, window_bounds = array<i64: 128, 128>}, {pipeline_mode = #tpu.pipeline_mode<synchronous>, transform_indices = @transform_2, window_bounds = array<i64: 1, 128>}, {transform_indices = @transform_3, window_bounds = array<i64: 1, 128, 128>}, {transform_indices = @transform_4, window_bounds = array<i64: 1, 1, 128>}, {pipeline_mode = #tpu.pipeline_mode<synchronous>, transform_indices = @transform_5, window_bounds = array<i64: 128, 128>}, {pipeline_mode = #tpu.pipeline_mode<synchronous>, transform_indices = @transform_6, window_bounds = array<i64: 1, 128>}, {transform_indices = @transform_7, window_bounds = array<i64: 8, 128>}]} {
    %c0_i32 = arith.constant 0 : i32
    %0 = arith.cmpi eq, %arg1, %c0_i32 : i32
    %1 = arith.extui %0 : i1 to i32
    %c0_i32_0 = arith.constant 0 : i32
    %2 = arith.cmpi ne, %1, %c0_i32_0 : i32
    scf.if %2 {
      %c0_17 = arith.constant 0 : index
      %c0_18 = arith.constant 0 : index
      %36 = vector.load %arg2[%c0_17, %c0_18] : memref<8x128xf32, #tpu.memory_space<vmem>>, vector<8x128xf32>
      %37 = arith.truncf %36 : vector<8x128xf32> to vector<8x128xbf16>
      %c0_19 = arith.constant 0 : index
      %c0_20 = arith.constant 0 : index
      %38 = vector.load %arg3[%c0_19, %c0_20] : memref<128x128xbf16, #tpu.memory_space<vmem>>, vector<128x128xbf16>
      %cst_21 = arith.constant dense<0.000000e+00> : vector<8x128xf32>
      %39 = tpu.matmul %37, %38, %cst_21 {dimension_numbers = #tpu.dot_dimension_numbers<[1], [0], [0], [1], [0, 0, 1, 1], [], []>} : vector<8x128xbf16>, vector<128x128xbf16>, vector<8x128xf32> -> vector<8x128xf32>
      %c0_22 = arith.constant 0 : index
      %c0_23 = arith.constant 0 : index
      %40 = vector.load %arg4[%c0_22, %c0_23] : memref<1x128xf32, #tpu.memory_space<vmem>>, vector<1x128xf32>
      %41 = vector.broadcast %40 : vector<1x128xf32> to vector<8x128xf32>
      %42 = arith.addf %39, %41 : vector<8x128xf32>
      %cst_24 = arith.constant dense<0.000000e+00> : vector<8xf32>
      %43 = vector.multi_reduction <add>, %42, %cst_24 [1] : vector<8x128xf32> to vector<8xf32>
      %44 = vector.shape_cast %43 : vector<8xf32> to vector<8x1xf32>
      %cst_25 = arith.constant 3.125000e-02 : f32
      %45 = vector.broadcast %cst_25 : f32 to vector<8x1xf32>
      %46 = arith.mulf %44, %45 : vector<8x1xf32>
      %47 = arith.mulf %42, %42 : vector<8x128xf32>
      %cst_26 = arith.constant dense<0.000000e+00> : vector<8xf32>
      %48 = vector.multi_reduction <add>, %47, %cst_26 [1] : vector<8x128xf32> to vector<8xf32>
      %49 = vector.shape_cast %48 : vector<8xf32> to vector<8x1xf32>
      %cst_27 = arith.constant 3.125000e-02 : f32
      %50 = vector.broadcast %cst_27 : f32 to vector<8x1xf32>
      %51 = arith.mulf %49, %50 : vector<8x1xf32>
      %52 = arith.mulf %46, %46 : vector<8x1xf32>
      %53 = arith.subf %51, %52 : vector<8x1xf32>
      %54 = vector.broadcast %46 : vector<8x1xf32> to vector<8x128xf32>
      %55 = arith.subf %42, %54 : vector<8x128xf32>
      %cst_28 = arith.constant 9.99999974E-6 : f32
      %56 = vector.broadcast %cst_28 : f32 to vector<8x1xf32>
      %57 = arith.addf %53, %56 : vector<8x1xf32>
      %58 = math.rsqrt %57 : vector<8x1xf32>
      %59 = vector.broadcast %58 : vector<8x1xf32> to vector<8x128xf32>
      %60 = arith.mulf %55, %59 : vector<8x128xf32>
      %cst_29 = arith.constant 0.000000e+00 : f32
      %61 = vector.broadcast %cst_29 : f32 to vector<8x128xf32>
      %62 = arith.maximumf %60, %61 : vector<8x128xf32>
      %c0_30 = arith.constant 0 : index
      %c0_31 = arith.constant 0 : index
      %63 = vector.load %arg10[%c0_30, %c0_31] : memref<8x128xf32, #tpu.memory_space<vmem>>, vector<8x128xf32>
      tpu.vector_store %arg10[%c0_30, %c0_31], %62 {strides = array<i32>} : memref<8x128xf32, #tpu.memory_space<vmem>>, vector<8x128xf32>,
    } else {
    }
    %c0 = arith.constant 0 : index
    %c0_1 = arith.constant 0 : index
    %3 = vector.load %arg10[%c0, %c0_1] : memref<8x128xf32, #tpu.memory_space<vmem>>, vector<8x128xf32>
    %4 = arith.truncf %3 : vector<8x128xf32> to vector<8x128xbf16>
    %c0_2 = arith.constant 0 : index
    %c0_3 = arith.constant 0 : index
    %c0_4 = arith.constant 0 : index
    %5 = vector.load %arg5[%c0_2, %c0_3, %c0_4] : memref<1x128x128xbf16, #tpu.memory_space<vmem>>, vector<1x128x128xbf16>
    %6 = vector.shape_cast %5 : vector<1x128x128xbf16> to vector<128x128xbf16>
    %cst = arith.constant dense<0.000000e+00> : vector<8x128xf32>
    %7 = tpu.matmul %4, %6, %cst {dimension_numbers = #tpu.dot_dimension_numbers<[1], [0], [0], [1], [0, 0, 1, 1], [], []>} : vector<8x128xbf16>, vector<128x128xbf16>, vector<8x128xf32> -> vector<8x128xf32>
    %c0_5 = arith.constant 0 : index
    %c0_6 = arith.constant 0 : index
    %c0_7 = arith.constant 0 : index
    %8 = vector.load %arg6[%c0_5, %c0_6, %c0_7] : memref<1x1x128xf32, #tpu.memory_space<vmem>>, vector<1x1x128xf32>
    %9 = vector.shape_cast %8 : vector<1x1x128xf32> to vector<1x128xf32>
    %10 = vector.broadcast %9 : vector<1x128xf32> to vector<8x128xf32>
    %11 = arith.addf %7, %10 : vector<8x128xf32>
    %cst_8 = arith.constant dense<0.000000e+00> : vector<8xf32>
    %12 = vector.multi_reduction <add>, %11, %cst_8 [1] : vector<8x128xf32> to vector<8xf32>
    %13 = vector.shape_cast %12 : vector<8xf32> to vector<8x1xf32>
    %cst_9 = arith.constant 3.125000e-02 : f32
    %14 = vector.broadcast %cst_9 : f32 to vector<8x1xf32>
    %15 = arith.mulf %13, %14 : vector<8x1xf32>
    %16 = arith.mulf %11, %11 : vector<8x128xf32>
    %cst_10 = arith.constant dense<0.000000e+00> : vector<8xf32>
    %17 = vector.multi_reduction <add>, %16, %cst_10 [1] : vector<8x128xf32> to vector<8xf32>
    %18 = vector.shape_cast %17 : vector<8xf32> to vector<8x1xf32>
    %cst_11 = arith.constant 3.125000e-02 : f32
    %19 = vector.broadcast %cst_11 : f32 to vector<8x1xf32>
    %20 = arith.mulf %18, %19 : vector<8x1xf32>
    %21 = arith.mulf %15, %15 : vector<8x1xf32>
    %22 = arith.subf %20, %21 : vector<8x1xf32>
    %23 = vector.broadcast %15 : vector<8x1xf32> to vector<8x128xf32>
    %24 = arith.subf %11, %23 : vector<8x128xf32>
    %cst_12 = arith.constant 9.99999974E-6 : f32
    %25 = vector.broadcast %cst_12 : f32 to vector<8x1xf32>
    %26 = arith.addf %22, %25 : vector<8x1xf32>
    %27 = math.rsqrt %26 : vector<8x1xf32>
    %28 = vector.broadcast %27 : vector<8x1xf32> to vector<8x128xf32>
    %29 = arith.mulf %24, %28 : vector<8x128xf32>
    %cst_13 = arith.constant 0.000000e+00 : f32
    %30 = vector.broadcast %cst_13 : f32 to vector<8x128xf32>
    %31 = arith.maximumf %29, %30 : vector<8x128xf32>
    %c0_14 = arith.constant 0 : index
    %c0_15 = arith.constant 0 : index
    %32 = vector.load %arg10[%c0_14, %c0_15] : memref<8x128xf32, #tpu.memory_space<vmem>>, vector<8x128xf32>
    tpu.vector_store %arg10[%c0_14, %c0_15], %31 {strides = array<i32>} : memref<8x128xf32, #tpu.memory_space<vmem>>, vector<8x128xf32>,
    %c1_i32 = arith.constant 1 : i32
    %33 = arith.cmpi eq, %arg1, %c1_i32 : i32
    %34 = arith.extui %33 : i1 to i32
    %c0_i32_16 = arith.constant 0 : i32
    %35 = arith.cmpi ne, %34, %c0_i32_16 : i32
    scf.if %35 {
      %c0_17 = arith.constant 0 : index
      %c0_18 = arith.constant 0 : index
      %36 = vector.load %arg10[%c0_17, %c0_18] : memref<8x128xf32, #tpu.memory_space<vmem>>, vector<8x128xf32>
      %37 = arith.truncf %36 : vector<8x128xf32> to vector<8x128xbf16>
      %c0_19 = arith.constant 0 : index
      %c0_20 = arith.constant 0 : index
      %38 = vector.load %arg7[%c0_19, %c0_20] : memref<128x128xbf16, #tpu.memory_space<vmem>>, vector<128x128xbf16>
      %cst_21 = arith.constant dense<0.000000e+00> : vector<8x128xf32>
      %39 = tpu.matmul %37, %38, %cst_21 {dimension_numbers = #tpu.dot_dimension_numbers<[1], [0], [0], [1], [0, 0, 1, 1], [], []>} : vector<8x128xbf16>, vector<128x128xbf16>, vector<8x128xf32> -> vector<8x128xf32>
      %c0_22 = arith.constant 0 : index
      %c0_23 = arith.constant 0 : index
      %40 = vector.load %arg8[%c0_22, %c0_23] : memref<1x128xf32, #tpu.memory_space<vmem>>, vector<1x128xf32>
      %41 = vector.broadcast %40 : vector<1x128xf32> to vector<8x128xf32>
      %42 = arith.addf %39, %41 : vector<8x128xf32>
      %43 = tpu.iota {dimensions = array<i32: 1>} : vector<8x128xi32>
      %c16_i32 = arith.constant 16 : i32
      %44 = vector.broadcast %c16_i32 : i32 to vector<8x128xi32>
      %45 = arith.cmpi slt, %43, %44 : vector<8x128xi32>
      %cst_24 = arith.constant -1.000000e+30 : f32
      %46 = vector.broadcast %cst_24 : f32 to vector<8x128xf32>
      %47 = arith.select %45, %42, %46 : vector<8x128xi1>, vector<8x128xf32>
      %cst_25 = arith.constant dense<0xFF800000> : vector<8xf32>
      %48 = vector.multi_reduction <maximumf>, %47, %cst_25 [1] : vector<8x128xf32> to vector<8xf32>
      %49 = vector.shape_cast %48 : vector<8xf32> to vector<8x1xf32>
      %50 = vector.broadcast %49 : vector<8x1xf32> to vector<8x128xf32>
      %51 = arith.subf %47, %50 : vector<8x128xf32>
      %52 = math.exp %51 : vector<8x128xf32>
      %cst_26 = arith.constant dense<0.000000e+00> : vector<8xf32>
      %53 = vector.multi_reduction <add>, %52, %cst_26 [1] : vector<8x128xf32> to vector<8xf32>
      %54 = vector.shape_cast %53 : vector<8xf32> to vector<8x1xf32>
      %55 = tpu.reciprocal %54 : vector<8x1xf32> -> vector<8x1xf32>
      %56 = vector.broadcast %55 : vector<8x1xf32> to vector<8x128xf32>
      %57 = arith.mulf %52, %56 : vector<8x128xf32>
      %c0_27 = arith.constant 0 : index
      %c0_28 = arith.constant 0 : index
      %58 = vector.load %arg9[%c0_27, %c0_28] : memref<8x128xf32, #tpu.memory_space<vmem>>, vector<8x128xf32>
      tpu.vector_store %arg9[%c0_27, %c0_28], %57 {strides = array<i32>} : memref<8x128xf32, #tpu.memory_space<vmem>>, vector<8x128xf32>,
    } else {
    }
    return
  }
  func.func @transform_0(%arg0: i32, %arg1: i32) -> (i32, i32) {
    %c0_i32 = arith.constant 0 : i32
    %c0_i32_0 = arith.constant 0 : i32
    return %arg0, %c0_i32 : i32, i32
  }
  func.func @transform_1(%arg0: i32, %arg1: i32) -> (i32, i32) {
    %c0_i32 = arith.constant 0 : i32
    %c0_i32_0 = arith.constant 0 : i32
    %c0_i32_1 = arith.constant 0 : i32
    return %c0_i32, %c0_i32_0 : i32, i32
  }
  func.func @transform_2(%arg0: i32, %arg1: i32) -> (i32, i32) {
    %c0_i32 = arith.constant 0 : i32
    %c0_i32_0 = arith.constant 0 : i32
    %c0_i32_1 = arith.constant 0 : i32
    return %c0_i32, %c0_i32_0 : i32, i32
  }
  func.func @transform_3(%arg0: i32, %arg1: i32) -> (i32, i32, i32) {
    %c0_i32 = arith.constant 0 : i32
    %c0_i32_0 = arith.constant 0 : i32
    %c0_i32_1 = arith.constant 0 : i32
    return %arg1, %c0_i32, %c0_i32_0 : i32, i32, i32
  }
  func.func @transform_4(%arg0: i32, %arg1: i32) -> (i32, i32, i32) {
    %c0_i32 = arith.constant 0 : i32
    %c0_i32_0 = arith.constant 0 : i32
    %c0_i32_1 = arith.constant 0 : i32
    return %arg1, %c0_i32, %c0_i32_0 : i32, i32, i32
  }
  func.func @transform_5(%arg0: i32, %arg1: i32) -> (i32, i32) {
    %c0_i32 = arith.constant 0 : i32
    %c0_i32_0 = arith.constant 0 : i32
    %c0_i32_1 = arith.constant 0 : i32
    return %c0_i32, %c0_i32_0 : i32, i32
  }
  func.func @transform_6(%arg0: i32, %arg1: i32) -> (i32, i32) {
    %c0_i32 = arith.constant 0 : i32
    %c0_i32_0 = arith.constant 0 : i32
    %c0_i32_1 = arith.constant 0 : i32
    return %c0_i32, %c0_i32_0 : i32, i32
  }
  func.func @transform_7(%arg0: i32, %arg1: i32) -> (i32, i32) {
    %c0_i32 = arith.constant 0 : i32
    %c0_i32_0 = arith.constant 0 : i32
    return %arg0, %c0_i32 : i32, i32
  }
}

</mosaic_0001>

<bundles_post_ra>
// kernel: tpu_custom_call.1
= control target key start
LH: loop header
LB: loop body
LE: loop exit
PB: predicated region body
PF: predicated region fallthrough
CT: control target
= control target key end

     0   :  { %s1668_s0 = inlined_call_operand.hbm [shape: f32[8,128], index: 0, kind: input, shape index: {}]   ;;  %s1669_s1 = inlined_call_operand.hbm [shape: bf16[128,128], index: 1, kind: input, shape index: {}]   ;;  %s1670_s2 = inlined_call_operand.vmem [shape: f32[1,128], index: 2, kind: input, shape index: {}]   ;;  %s1671_s3 = inlined_call_operand.hbm [shape: bf16[2,128,128], index: 3, kind: input, shape index: {}]   ;;  %s1672_s4 = inlined_call_operand.vmem [shape: f32[2,1,128], index: 4, kind: input, shape index: {}]   ;;  %s1673_s5 = inlined_call_operand.hbm [shape: bf16[128,128], index: 5, kind: input, shape index: {}]   ;;  %s1674_s6 = inlined_call_operand.vmem [shape: f32[1,128], index: 6, kind: input, shape index: {}]   ;;  %s1675_s7 = inlined_call_operand.hbm [shape: f32[8,128], index: 7, kind: output, shape index: {}]  }
   0x1   :  { %1681 = sst [smem:[#allocation16_spill]] %s1668_s0 }
   0x2   :  { %1682 = sst [smem:[#allocation17_spill]] %s1674_s6 }
   0x3   :  { %1683 = sst [smem:[#allocation18_spill]] %s1675_s7 }
   0x4   :  { %12 = vsyncpa [#allocation4], 0 }
   0x5   :  { %13 = vsyncpa [#allocation7], 0 }
   0x6   :  { %14 = vsyncpa [#allocation5], 0  ;;  %s1392_s24 = smov 0   ;;  %s1394_s25 = smov 0  }
   0x7   :  { %s1396_s26 = smov 0   ;;  %s1398_s27 = smov 0  }
   0x8   :  { %s1400_s28 = smov 0   ;;  %s1402_s29 = smov 0  }
   0x9 LB: > { %s1421_s30 = sadd.s32 4294967295, %s1337_s29   ;;  %p114_p0 = scmp.ne.s32.totalorder %s1325_s26, %s1321_s25  ;;  %s1337_s29 = sphi %s1402_s29, %s20_s29   ;;  %s1333_s28 = sphi %s1400_s28, %s1705_s28   ;;  %s1329_s27 = sphi %s1398_s27, %s1704_s27   ;;  %s1325_s26 = sphi %s1396_s26, %s1703_s26   ;;  %s1321_s25 = sphi %s1394_s25, %s1702_s25   ;;  %s1317_s24 = sphi %s1392_s24, %s1701_s24  }
   0xa   : > { %p115_p1 = scmp.eq.s32.totalorder %s1337_s29, 0  ;;  %p120_p2 = scmp.ne.s32.totalorder %s1321_s25, %s1317_s24 }
   0xb   : > { %p1676_p3 = scmp.eq.s32.totalorder %s1421_s30, 0  ;;  %p864_p4 = scmp.ge.s32.totalorder %s1337_s29, 1 }
   0xc   : > { %p116_p5 = por %p115_p1, %p114_p0  ;;  %p225_p6 = scmp.lt.s32.totalorder %s1337_s29, 3 }
   0xd   : > { %p1432_p7 = por %p1676_p3, %p120_p2  ;;  %s1339_s10 = smov [#allocation3]  }
   0xe   : > { %p1436_p8 = pnand %p864_p4, %p225_p6  ;;  %s240_s11 = sshll.u32 %s1339_s10, 4  ;;  %s241_s11 = int_to_ptr.vmem [resolvable:$true] %s240_s11 }
   0xf   : > { %s1684_s8 = scalar_select %p1432_p7, 1, 0 }
  0x10   : > { %s1685_s9 = scalar_select %p1436_p8, 1, 0 }
  0x11   : > { %p1016_p9 = pneg %p1436_p8  ;;  %p1033_p10 = scmp.lt.s32.totalorder %s1337_s29, 2 }
  0x12   : > { %s1340_s13 = smov [#allocation6]   ;;  %s1688_s0 = sld [smem:[#allocation16_spill]] }
  0x13   : > { %p1445_p11 = pnand %p1016_p9, %p1676_p3  ;;  %s250_s14 = sshll.u32 %s1340_s13, 4  ;;  %s1453_s14 = int_to_ptr.vmem [resolvable:$true] %s250_s14 }
  0x14   : > { %p1449_p12 = pnand %p1033_p10, %p116_p5 }
  0x15   : > { %p1463_p0 = pneg %p1445_p11 }
  0x16   : > { %s1687_s15 = scalar_select %p1449_p12, 1, 0 }
  0x18   : > { %s1131_s18 = scalar_lea.hbm %s1688_s0, 128 }
  0x19   : > { %p1132_p13 = scmp.ne.s32.totalorder %s1688_s0, %s1131_s18  ;;  %p1138_p4 = scmp.lt.u32.totalorder %s1131_s18, %s1688_s0 }
  0x1b   : > { %p1134_p1 = pnand %p1463_p0, %p1132_p13 }
  0x1d   : > { %p1135_p2 = pneg %p1134_p1 }
  0x1f   : > { %p1140_p5 = pnand %p1138_p4, %p1135_p2 }
  0x21   : > { %1143 = shalt.err (!%p1140_p5)
}
  0x22   : > { %s1144_s24 = scalar_lea.vmem %s241_s11, 128  ;;  %p1152_p3 = scmp.lt.s32.totalorder %s241_s11, %s241_s11 }
  0x23   : > { %p1145_p6 = scmp.ne.s32.totalorder %s241_s11, %s1144_s24  ;;  %p1153_p7 = scmp.lt.s32.totalorder %s1144_s24, %s1144_s24 }
  0x25   : > { %p1147_p9 = pnand %p1145_p6, %p1463_p0  ;;  %p1154_p8 = por %p1153_p7, %p1152_p3 }
  0x27   : > { %p1148_p10 = pneg %p1147_p9 }
  0x29   : > { %p1155_p12 = pnand %p1154_p8, %p1148_p10 }
  0x2b   : > { %1158 = shalt.err (!%p1155_p12)
}
  0x2c   : > { %1019 = dma.hbm_to_vmem [thread:$0]  (!%p1445_p11), %s1688_s0, 128, %s241_s11, [#allocation4]  }
  0x2d   : > { %s1159_s18 = scalar_lea.hbm %s1669_s1, 1024 }
  0x2e   : > { %p1160_p13 = scmp.ne.s32.totalorder %s1669_s1, %s1159_s18  ;;  %p1166_p7 = scmp.lt.u32.totalorder %s1159_s18, %s1669_s1 }
  0x30   : > { %p1162_p1 = pnand %p1160_p13, %p1463_p0 }
  0x32   : > { %p1163_p3 = pneg %p1162_p1 }
  0x34   : > { %p1168_p8 = pnand %p1166_p7, %p1163_p3 }
  0x36   : > { %1171 = shalt.err (!%p1168_p8)
}
  0x37   : > { %s1172_s11 = scalar_lea.vmem %s1453_s14, 1024  ;;  %p1180_p5 = scmp.lt.s32.totalorder %s1453_s14, %s1453_s14 }
  0x38   : > { %p1173_p12 = scmp.ne.s32.totalorder %s1453_s14, %s1172_s11  ;;  %p1181_p6 = scmp.lt.s32.totalorder %s1172_s11, %s1172_s11 }
  0x3a   : > { %p1175_p2 = pnand %p1173_p12, %p1463_p0  ;;  %p1182_p9 = por %p1181_p6, %p1180_p5 }
  0x3c   : > { %p1176_p4 = pneg %p1175_p2 }
  0x3e   : > { %p1183_p10 = pnand %p1182_p9, %p1176_p4 }
  0x40   : > { %1186 = shalt.err (!%p1183_p10)
}
  0x41   : > { %s1341_s24 = smov 64   ;;  %s1342_s10 = smov 4  }
  0x42   : > { %1022 = dma.hbm_to_vmem [thread:$0]  (!%p1445_p11), %s1669_s1, 1024, %s1453_s14, [#allocation7], %s1341_s24, %s1341_s24, %s1342_s10  }
  0x43   : > { %s1343_s17 = smov [#allocation9]   ;;  %s29_s19 = sadd.s32 1, %s1333_s28 }
  0x44   : > { %s266_s18 = sshll.u32 %s1343_s17, 4  ;;  %s1187_s23 = scalar_lea.hbm %s1673_s5, 1024  ;;  %s267_s18 = int_to_ptr.vmem [resolvable:$true] %s266_s18 }
  0x45   : > { %p1188_p13 = scmp.ne.s32.totalorder %s1673_s5, %s1187_s23  ;;  %p1194_p7 = scmp.lt.u32.totalorder %s1187_s23, %s1673_s5 }
  0x47   : > { %p1190_p1 = pnand %p1188_p13, %p1463_p0 }
  0x49   : > { %p1191_p3 = pneg %p1190_p1 }
  0x4b   : > { %p1196_p8 = pnand %p1194_p7, %p1191_p3 }
  0x4d   : > { %1199 = shalt.err (!%p1196_p8)
}
  0x4e   : > { %s1200_s14 = scalar_lea.vmem %s267_s18, 1024  ;;  %p1208_p5 = scmp.lt.s32.totalorder %s267_s18, %s267_s18 }
  0x4f   : > { %p1201_p12 = scmp.ne.s32.totalorder %s267_s18, %s1200_s14  ;;  %p1209_p6 = scmp.lt.s32.totalorder %s1200_s14, %s1200_s14 }
  0x51   : > { %p1203_p2 = pnand %p1201_p12, %p1463_p0  ;;  %p1210_p9 = por %p1209_p6, %p1208_p5 }
  0x53   : > { %p1204_p4 = pneg %p1203_p2 }
  0x55   : > { %p1211_p10 = pnand %p1210_p9, %p1204_p4 }
  0x57   : > { %1214 = shalt.err (!%p1211_p10)
}
  0x58   : > { %1025 = dma.hbm_to_vmem [thread:$0]  (!%p1445_p11), %s1673_s5, 1024, %s267_s18, [#allocation7], %s1341_s24, %s1341_s24, %s1342_s10  }
  0x59   : > { %p30_p0 = scmp.ge.s32.totalorder %s29_s19, 2  ;;  %s107_s7 = sadd.s32 1, %s1325_s26 }
  0x5a   : > { %s283_s21 = sand.u32 1, %s1337_s29   ;;  %s285_s13 = sand.u32 1, %s1325_s26  }
  0x5b   : > { %s1707_s19 = smov (%p30_p0, %s29_s19), 0  ;;  %s869_s12 = sshll.u32 %s285_s13, 6 }
  0x5c   : > { %s104_s16 = ssub.s32 %s1333_s28, %s1707_s19  ;;  %s910_s17 = sshll.u32 %s1333_s28, 10 }
  0x5d   : > { %p105_p13 = scmp.eq.s32.totalorder %s104_s16, 0  ;;  %s1538_s23 = scalar_lea.hbm %s1671_s3, %s910_s17 }
  0x5e   : > { %s287_s18 = scalar_lea.vmem [#allocation8], %s869_s12  ;;  %s1545_s0 = scalar_lea.sflag [#allocation4], %s283_s21 }
  0x5f   : > { %s294_s11 = sshll.u32 %s287_s18, 4  ;;  %s1215_s6 = scalar_lea.hbm %s1538_s23, 1024  ;;  %s1543_s11 = int_to_ptr.vmem [resolvable:$true] %s294_s11 }
  0x60   : > { %s1541_s14 = scalar_select %p105_p13, %s1325_s26, %s107_s7  }
  0x61   : > { %p1216_p11 = scmp.ne.s32.totalorder %s1538_s23, %s1215_s6  ;;  %p1690_p1 = scmp.ne.s32.totalorder %s1687_s15, 0 }
  0x62   : > { %s1220_s17 = scalar_lea.hbm %s1671_s3, 2048  ;;  %p1221_p12 = scmp.lt.u32.totalorder %s1538_s23, %s1671_s3 }
  0x63   : > { %p1217_p3 = pneg %p1690_p1  ;;  %p1222_p2 = scmp.lt.u32.totalorder %s1220_s17, %s1215_s6 }
  0x64   : > { %p1224_p5 = scmp.lt.u32.totalorder %s1215_s6, %s1538_s23 }
  0x65   : > { %p1218_p7 = pnand %p1217_p3, %p1216_p11  ;;  %p1223_p4 = por %p1222_p2, %p1221_p12 }
  0x67   : > { %p1219_p8 = pneg %p1218_p7  ;;  %p1225_p6 = por %p1224_p5, %p1223_p4 }
  0x69   : > { %p1226_p9 = pnand %p1225_p6, %p1219_p8 }
  0x6b   : > { %1229 = shalt.err (!%p1226_p9)
}
  0x6c   : > { %s1230_s7 = scalar_lea.vmem %s1543_s11, 1024  ;;  %s1344_s21 = smov [#allocation8]  }
  0x6d   : > { %p1231_p10 = scmp.ne.s32.totalorder %s1543_s11, %s1230_s7  ;;  %s1235_s22 = sshll.u32 %s1344_s21, 4  ;;  %s1236_s22 = int_to_ptr.vmem [resolvable:$false] %s1235_s22 }
  0x6e   : > { %s1237_s18 = scalar_lea.vmem %s1236_s22, 2048  ;;  %p1238_p11 = scmp.lt.s32.totalorder %s1543_s11, %s1236_s22 }
  0x6f   : > { %p1233_p0 = pnand %p1231_p10, %p1217_p3  ;;  %p1239_p7 = scmp.lt.s32.totalorder %s1237_s18, %s1230_s7 }
  0x71   : > { %p1234_p13 = pneg %p1233_p0  ;;  %p1240_p12 = por %p1239_p7, %p1238_p11 }
  0x73   : > { %p1241_p2 = pnand %p1240_p12, %p1234_p13 }
  0x75   : > { %1244 = shalt.err (!%p1241_p2)
}
  0x76   : > { %1029 = dma.hbm_to_vmem [thread:$0]  (!%p1690_p1), %s1538_s23, 1024, %s1543_s11, %s1545_s0, %s1341_s24, %s1341_s24, %s1342_s10  }
  0x77   : > { %p1691_p3 = scmp.ne.s32.totalorder %s1685_s9, 0 }
  0x78   : > { %p1692_p8 = scmp.eq.s32.totalorder (!%p1691_p3), %s1421_s30, 0 }
  0x79   : > { %312 = sbr.rel (%p1691_p3) target bundleno = 1541 (0x605), region = 48 }
  0x80   : > { %1296 = dma.done.wait (%p1692_p8), [#allocation4], 128   ;;  %p1693_p4 = pmov %p1692_p8 }
  0x82   : > { %1298 = vsyncadd (%p1693_p4), [#allocation4], 4294967168  ;;  %p1694_p5 = pmov %p1693_p4 }
  0x83   : > { %p1695_p6 = pmov %p1693_p4 }
  0x84   : > { %1300 = dma.done.wait (%p1694_p5), [#allocation7], 1024  }
  0x85   : > { %1302 = vsyncadd (%p1695_p6), [#allocation7], 4294966272  ;;  %s322_s15 = sand.u32 1, %s1421_s30   ;;  %s324_s24 = sand.u32 1, %s1321_s25  }
  0x86   : > { %s875_s10 = sshll.u32 %s324_s24, 6  ;;  %s323_s9 = scalar_lea.sflag [#allocation4], %s322_s15 }
  0x87   : > { %s1588_s23 = scalar_lea.vmem [#allocation8], %s875_s10  ;;  %p1696_p1 = scmp.ne.s32.totalorder %s1684_s8, 0 }
  0x89   : > { %1304 = dma.done.wait (%p1696_p1), %s323_s9, 1024  }
  0x8a   : > { %1306 = vsyncadd (%p1696_p1), %s323_s9, 4294966272  ;;  %p1697_p9 = pmov %p1693_p4 }
  0x8b   : > { %p1698_p10 = pmov %p1693_p4 }
  0x8c   : > { %1308 = dma.done.wait (%p1697_p9), [#allocation7], 1024  }
  0x8d   : > { %1310 = vsyncadd (%p1698_p10), [#allocation7], 4294966272  ;;  %p359_p0 = scmp.lt.s32.totalorder %s1329_s27, 1  ;;  %p877_p13 = scmp.ne.s32.totalorder %s1329_s27, 0 }
  0x8e   : > { %v1099_v0 = vld [vmem:[#allocation6] sm:$0xff] (!%p877_p13)   ;;  %v1345_v1 = vmov (!%p877_p13), 0.0   ;;  %v1100_v2 = vld [vmem:[#allocation6 + $0x8] sm:$0xff] (!%p877_p13)   ;;  %vm1346_vm0 = vmmov (!%p877_p13), 0   ;;  %v1101_v3 = vld [vmem:[#allocation6 + $0x10] sm:$0xff] (!%p877_p13)  }
  0x8f   : > { %s1600_s11 = scalar_select %p359_p0, %s1329_s27, 1 }
  0x90   : > { %366 = sbr.rel (%p877_p13) target bundleno = 558 (0x22e), region = 68  ;;  %938 = vmatprep.subr.bf16.mxu0 (!%p877_p13), %v1345_v1  ;;  %954 = vmatprep.mubr.msk.bf16.mxu0 (!%p877_p13), %vm1346_vm0, %v1345_v1  ;;  %v1102_v4 = vld [vmem:[#allocation6 + $0x18] sm:$0xff] (!%p877_p13)   ;;  %v1103_v5 = vld [vmem:[#allocation6 + $0x20] sm:$0xff] (!%p877_p13)   ;;  %v1104_v6 = vld [vmem:[#allocation6 + $0x28] sm:$0xff] (!%p877_p13)  }
  0x91   : > { %s361_s13 = scalar_lea.vmem %s1672_s4, %s1600_s11  ;;  %939 = vmatpush3.bf16.msra.mxu0 (!%p877_p13), %v1099_v0  ;;  %v1105_v7 = vld [vmem:[#allocation6 + $0x30] sm:$0xff] (!%p877_p13)   ;;  %v1106_v8 = vld [vmem:[#allocation6 + $0x38] sm:$0xff] (!%p877_p13)  }
  0x92   : > { %940 = vmatprep.subr.bf16.mxu0 (!%p877_p13), %v1345_v1  ;;  %v367_v9 = vld [vmem:[#allocation3] sm:$0xff] (!%p877_p13)  ;;  %v878_v11 = vld [vmem:[%s1670_s2] ss:$0 sm:$0xff] (!%p877_p13) }
  0x93   : > { %v368_v10 = vpack.c.bf16 (!%p877_p13), %v367_v9, %v367_v9 }
  0x95   : > { %941 = vmatpush3.bf16.msra.mxu0 (!%p877_p13), %v1100_v2 }
  0x96   : > { %942 = vmatprep.subr.bf16.mxu0 (!%p877_p13), %v1345_v1 }
  0x99   : > { %943 = vmatpush3.bf16.msra.mxu0 %v1101_v3 }
  0x9a   : > { %944 = vmatprep.subr.bf16.mxu0 %v1345_v1 }
  0x9d   : > { %945 = vmatpush3.bf16.msra.mxu0 %v1102_v4 }
  0x9e   : > { %946 = vmatprep.subr.bf16.mxu0 %v1345_v1 }
  0xa1   : > { %947 = vmatpush3.bf16.msra.mxu0 %v1103_v5 }
  0xa2   : > { %948 = vmatprep.subr.bf16.mxu0 %v1345_v1 }
  0xa5   : > { %949 = vmatpush3.bf16.msra.mxu0 %v1104_v6 }
  0xa6   : > { %950 = vmatprep.subr.bf16.mxu0 %v1345_v1 }
  0xa9   : > { %951 = vmatpush3.bf16.msra.mxu0 %v1105_v7 }
  0xaa   : > { %952 = vmatprep.subr.bf16.mxu0 %v1345_v1 }
  0xad   : > { %953 = vmatpush3.bf16.msra.mxu0 %v1106_v8 }
  0xb0   : > { %955 = vmatmul.mubr.bf16.vlgmr.msra.gmra.mrb[0].mxu0 %v368_v10 }
 0x183   : > { %v474_v12 = vpop.f32.mrb[0].mxu0 }
 0x184   : > { %v475_v13 = vadd.f32 %v878_v11, %v474_v12  ;;  %v956_v14 = vpop.f32.mrb[1].mxu0 }
 0x185   : > { %v477_v15 = vpop.f32.mrb[2].mxu0 }
 0x186   : > { %480 = vadd.xlane.f32.xlu0 %v475_v13  ;;  %v957_v16 = vpop.f32.mrb[3].mxu0  ;;  %v483_v17 = vmul.f32 %v475_v13, %v475_v13 }
 0x18a   : > { %484 = vadd.xlane.f32.xlu0 %v483_v17 }
 0x213   : > { %v481_v18 = vpop.xlane.xlu0 %480 }
 0x214   : > { %v482_v19 = vmul.f32 0.03125, %v481_v18 }
 0x216   : > { %v487_v21 = vmul.f32 %v482_v19, %v482_v19  ;;  %v489_v25 = vsub.f32 %v475_v13, %v482_v19 }
 0x217   : > { %v485_v20 = vpop.xlane.xlu0 %484 }
 0x218   : > { %v486_v22 = vmul.f32 0.03125, %v485_v20 }
 0x21a   : > { %v488_v23 = vsub.f32 %v486_v22, %v487_v21 }
 0x21c   : > { %v490_v24 = vadd.f32 1e-05, %v488_v23 }
 0x21e   : > { %1107 = vrsqrt.f32 %v490_v24 }
 0x228   : > { %v1108_v26 = vpop.eup %1107 }
 0x229   : > { %v492_v27 = vmul.f32 %v1108_v26, %v489_v25 }
 0x22b   : > { %v493_v28 = vmax.f32 %v492_v27, 0.0 }
 0x22d   : > { %494 = vst [vmem:[#allocation2] sm:$0xff] %v493_v28 }
 0x22e PF: > { %v1109_v29 = vld [vmem:[%s1588_s23] sm:$0xff]   ;;  %v1347_v30 = vmov 0.0   ;;  %v1110_v31 = vld [vmem:[%s1588_s23 + $0x8] sm:$0xff]   ;;  %vm1348_vm1 = vmmov 0   ;;  %v1111_v32 = vld [vmem:[%s1588_s23 + $0x10] sm:$0xff]   ;;  %p896_p11 = scmp.ne.s32.totalorder %s1329_s27, 1 }
 0x22f   : > { %958 = vmatprep.subr.bf16.mxu0 %v1347_v30  ;;  %974 = vmatprep.mubr.msk.bf16.mxu0 %vm1348_vm1, %v1347_v30  ;;  %v1112_v33 = vld [vmem:[%s1588_s23 + $0x18] sm:$0xff]   ;;  %v1113_v34 = vld [vmem:[%s1588_s23 + $0x20] sm:$0xff]   ;;  %v1114_v35 = vld [vmem:[%s1588_s23 + $0x28] sm:$0xff]   ;;  %v1349_v59 = vmov (!%p896_p11), 0.0   ;;  %vm1350_vm2 = vmmov (!%p896_p11), 0   ;;  %v740_v5 = vlaneseq (!%p896_p11)  ;;  %s1699_s7 = sld [smem:[#allocation17_spill]] (!%p896_p11) }
 0x230   : > { %959 = vmatpush3.bf16.msra.mxu0 %v1109_v29  ;;  %v1115_v36 = vld [vmem:[%s1588_s23 + $0x30] sm:$0xff]   ;;  %v1116_v37 = vld [vmem:[%s1588_s23 + $0x38] sm:$0xff]   ;;  %v1119_v58 = vld [vmem:[#allocation9] sm:$0xff] (!%p896_p11)  }
 0x231   : > { %960 = vmatprep.subr.bf16.mxu0 %v1347_v30  ;;  %v887_v40 = vld [vmem:[%s361_s13] ss:$0 sm:$0xff]  ;;  %v1120_v60 = vld [vmem:[#allocation9 + $0x8] sm:$0xff] (!%p896_p11)   ;;  %v1122_v62 = vld [vmem:[#allocation9 + $0x18] sm:$0xff] (!%p896_p11)   ;;  %v741_v6 = vand.u32 (!%p896_p11), 127, %v740_v5 }
 0x232   : > { %v1121_v61 = vld [vmem:[#allocation9 + $0x10] sm:$0xff] (!%p896_p11)   ;;  %v1123_v63 = vld [vmem:[#allocation9 + $0x20] sm:$0xff] (!%p896_p11)   ;;  %v1124_v0 = vld [vmem:[#allocation9 + $0x28] sm:$0xff] (!%p896_p11)  }
 0x233   : > { %v1125_v1 = vld [vmem:[#allocation9 + $0x30] sm:$0xff] (!%p896_p11)   ;;  %v1126_v2 = vld [vmem:[#allocation9 + $0x38] sm:$0xff] (!%p896_p11)   ;;  %vm742_vm3 = vcmp.lt.s32.totalorder (!%p896_p11), %v741_v6, 16 }
 0x234   : > { %961 = vmatpush3.bf16.msra.mxu0 %v1110_v31  ;;  %v495_v38 = vld [vmem:[#allocation2] sm:$0xff] }
 0x235   : > { %962 = vmatprep.subr.bf16.mxu0 %v1347_v30  ;;  %v496_v39 = vpack.c.bf16 %v495_v38, %v495_v38  ;;  %v897_v7 = vld [vmem:[%s1699_s7] ss:$0 sm:$0xff] (!%p896_p11) }
 0x238   : > { %963 = vmatpush3.bf16.msra.mxu0 %v1111_v32 }
 0x239   : > { %964 = vmatprep.subr.bf16.mxu0 %v1347_v30 }
 0x23c   : > { %965 = vmatpush3.bf16.msra.mxu0 %v1112_v33 }
 0x23d   : > { %966 = vmatprep.subr.bf16.mxu0 %v1347_v30 }
 0x240   : > { %967 = vmatpush3.bf16.msra.mxu0 %v1113_v34 }
 0x241   : > { %968 = vmatprep.subr.bf16.mxu0 %v1347_v30 }
 0x244   : > { %969 = vmatpush3.bf16.msra.mxu0 %v1114_v35 }
 0x245   : > { %970 = vmatprep.subr.bf16.mxu0 %v1347_v30 }
 0x248   : > { %971 = vmatpush3.bf16.msra.mxu0 %v1115_v36 }
 0x249   : > { %972 = vmatprep.subr.bf16.mxu0 %v1347_v30 }
 0x24c   : > { %973 = vmatpush3.bf16.msra.mxu0 %v1116_v37 }
 0x24d   : > { %978 = vmatprep.subr.bf16.mxu0 (!%p896_p11), %v1349_v59 }
 0x24f   : > { %975 = vmatmul.mubr.bf16.vlgmr.msra.gmra.mrb[0].mxu0 %v496_v39 }
 0x250   : > { %979 = vmatpush3.bf16.msra.mxu0 (!%p896_p11), %v1119_v58  ;;  %994 = vmatprep.mubr.msk.bf16.mxu0 (!%p896_p11), %vm1350_vm2, %v1349_v59 }
 0x251   : > { %980 = vmatprep.subr.bf16.mxu0 (!%p896_p11), %v1349_v59 }
 0x254   : > { %981 = vmatpush3.bf16.msra.mxu0 (!%p896_p11), %v1120_v60 }
 0x255   : > { %982 = vmatprep.subr.bf16.mxu0 (!%p896_p11), %v1349_v59 }
 0x258   : > { %983 = vmatpush3.bf16.msra.mxu0 (!%p896_p11), %v1121_v61 }
 0x259   : > { %984 = vmatprep.subr.bf16.mxu0 (!%p896_p11), %v1349_v59 }
 0x25c   : > { %985 = vmatpush3.bf16.msra.mxu0 (!%p896_p11), %v1122_v62 }
 0x25d   : > { %986 = vmatprep.subr.bf16.mxu0 (!%p896_p11), %v1349_v59 }
 0x260   : > { %987 = vmatpush3.bf16.msra.mxu0 (!%p896_p11), %v1123_v63 }
 0x261   : > { %988 = vmatprep.subr.bf16.mxu0 (!%p896_p11), %v1349_v59 }
 0x264   : > { %989 = vmatpush3.bf16.msra.mxu0 (!%p896_p11), %v1124_v0 }
 0x265   : > { %990 = vmatprep.subr.bf16.mxu0 (!%p896_p11), %v1349_v59 }
 0x268   : > { %991 = vmatpush3.bf16.msra.mxu0 (!%p896_p11), %v1125_v1 }
 0x269   : > { %992 = vmatprep.subr.bf16.mxu0 (!%p896_p11), %v1349_v59 }
 0x26c   : > { %993 = vmatpush3.bf16.msra.mxu0 (!%p896_p11), %v1126_v2 }
 0x322   : > { %v602_v41 = vpop.f32.mrb[0].mxu0 }
 0x323   : > { %v603_v42 = vadd.f32 %v887_v40, %v602_v41  ;;  %v976_v43 = vpop.f32.mrb[1].mxu0 }
 0x324   : > { %v605_v44 = vpop.f32.mrb[2].mxu0 }
 0x325   : > { %608 = vadd.xlane.f32.xlu0 %v603_v42  ;;  %v977_v45 = vpop.f32.mrb[3].mxu0  ;;  %v611_v46 = vmul.f32 %v603_v42, %v603_v42 }
 0x329   : > { %612 = vadd.xlane.f32.xlu0 %v611_v46 }
 0x3b2   : > { %v609_v47 = vpop.xlane.xlu0 %608 }
 0x3b3   : > { %v610_v48 = vmul.f32 0.03125, %v609_v47 }
 0x3b5   : > { %v615_v50 = vmul.f32 %v610_v48, %v610_v48  ;;  %v617_v54 = vsub.f32 %v603_v42, %v610_v48 }
 0x3b6   : > { %v613_v49 = vpop.xlane.xlu0 %612 }
 0x3b7   : > { %v614_v51 = vmul.f32 0.03125, %v613_v49 }
 0x3b9   : > { %v616_v52 = vsub.f32 %v614_v51, %v615_v50 }
 0x3bb   : > { %v618_v53 = vadd.f32 1e-05, %v616_v52 }
 0x3bd   : > { %1117 = vrsqrt.f32 %v618_v53 }
 0x3c6   : > { %626 = sbr.rel (%p896_p11) target bundleno = 1510 (0x5e6), region = 72 }
 0x3c7   : > { %v1118_v55 = vpop.eup %1117 }
 0x3c8   : > { %v620_v56 = vmul.f32 %v1118_v55, %v617_v54 }
 0x3ca   : > { %v621_v57 = vmax.f32 %v620_v56, 0.0 }
 0x3cc   : > { %622 = vst [vmem:[#allocation2] sm:$0xff] %v621_v57 }
 0x3d3   : > { %v627_v3 = vld [vmem:[#allocation2] sm:$0xff] }
 0x3d4   : > { %v628_v4 = vpack.c.bf16 %v627_v3, %v627_v3 }
 0x3d6   : > { %995 = vmatmul.mubr.bf16.vlgmr.msra.gmra.mrb[0].mxu0 %v628_v4 }
 0x4a9   : > { %v734_v8 = vpop.f32.mrb[0].mxu0 }
 0x4aa   : > { %v735_v9 = vadd.f32 %v897_v7, %v734_v8  ;;  %v996_v10 = vpop.f32.mrb[1].mxu0 }
 0x4ab   : > { %v737_v11 = vpop.f32.mrb[2].mxu0 }
 0x4ac   : > { %v997_v12 = vpop.f32.mrb[3].mxu0  ;;  %v743_v13 = vsel %vm742_vm3, %v735_v9, -1e+30 }
 0x4ad   : > { %744 = vmax.xlane.f32.xlu0 %v743_v13 }
 0x53a   : > { %v745_v14 = vpop.xlane.xlu0 %744 }
 0x53b   : > { %v746_v15 = vsub.f32 %v743_v13, %v745_v14 }
 0x53d   : > { %v747_v16 = vmul.f32 1.442695, %v746_v15 }
 0x53f   : > { %1127 = vpow2.f32 %v747_v16 }
 0x549   : > { %v1128_v17 = vpop.eup %1127 }
 0x54a   : > { %749 = vadd.xlane.f32.xlu0 %v1128_v17 }
 0x5d7   : > { %v750_v18 = vpop.xlane.xlu0 %749 }
 0x5d8   : > { %1129 = vrcp.f32 %v750_v18 }
 0x5e2   : > { %v1130_v19 = vpop.eup %1129 }
 0x5e3   : > { %v752_v20 = vmul.f32 %v1130_v19, %v1128_v17 }
 0x5e5   : > { %753 = vst [vmem:[#allocation10] sm:$0xff] %v752_v20 }
 0x5e6 PF: > { %p1037_p7 = scmp.eq.s32.totalorder %s1421_s30, 1  ;;  %s1351_s21 = smov [#allocation10]  }
 0x5e7   : > { %s763_s22 = sshll.u32 %s1351_s21, 4  ;;  %s764_s22 = int_to_ptr.vmem [resolvable:$true] %s763_s22 }
 0x5e8   : > { %s1245_s18 = scalar_lea.vmem %s764_s22, 128  ;;  %p1252_p8 = scmp.lt.s32.totalorder %s764_s22, %s764_s22 }
 0x5e9   : > { %p1246_p12 = scmp.ne.s32.totalorder %s764_s22, %s1245_s18  ;;  %p1253_p4 = scmp.lt.s32.totalorder %s1245_s18, %s1245_s18 }
 0x5eb   : > { %p1247_p2 = pnand %p1246_p12, %p1037_p7  ;;  %p1254_p5 = por %p1253_p4, %p1252_p8 }
 0x5ed   : > { %p1248_p3 = pneg %p1247_p2 }
 0x5ef   : > { %p1255_p6 = pnand %p1254_p5, %p1248_p3 }
 0x5f1   : > { %1258 = shalt.err (!%p1255_p6)
}
 0x5f2   : > { %s1700_s10 = sld [smem:[#allocation18_spill]] }
 0x5f8   : > { %s1259_s9 = scalar_lea.hbm %s1700_s10, 128 }
 0x5f9   : > { %p1260_p1 = scmp.ne.s32.totalorder %s1700_s10, %s1259_s9  ;;  %p1265_p0 = scmp.lt.u32.totalorder %s1259_s9, %s1700_s10 }
 0x5fb   : > { %p1261_p9 = pnand %p1260_p1, %p1037_p7 }
 0x5fd   : > { %p1262_p10 = pneg %p1261_p9 }
 0x5ff   : > { %p1267_p13 = pnand %p1265_p0, %p1262_p10 }
 0x601   : > { %1270 = shalt.err (!%p1267_p13)
}
 0x602   : > { %1013 = dma.vmem_to_hbm [thread:$0]  (%p1037_p7), %s764_s22, 128, %s1700_s10, [#allocation5]  }
 0x603   : > { %1312 = dma.done.wait (%p1037_p7), [#allocation5], 128  }
 0x604   : > { %1314 = vsyncadd (%p1037_p7), [#allocation5], 4294967168 }
 0x605 PF: > { %s20_s29 = sadd.s32 1, %s1337_s29   ;;  %s1701_s24 = smov %s1321_s25 }
 0x606   : > { %p17_p11 = scmp.ge.s32.totalorder %s20_s29, 4   ;;  %s1702_s25 = smov %s1325_s26 }
 0x607   : > { %s1703_s26 = smov %s1541_s14  ;;  %s1704_s27 = smov %s1333_s28 }
 0x608   : > { %s1705_s28 = smov %s1707_s19  ;;  %19 = sbr.rel (!%p17_p11) target bundleno = 9 (0x9), region = 109 }
 0x60f   :  { %776 = vsyncpa [#allocation4], 1 }
 0x610   :  { %778 = vsyncpa [#allocation4 + $0x1], 1 }
 0x611   :  { %779 = vsyncpa [#allocation7], 1 }
 0x612   :  { %780 = vsyncpa [#allocation5], 1 }
 0x613   :  { %782 = vsyncpa [#allocation5 + $0x1], 1 }

</bundles_post_ra>
